<compile_context>
chip_gen: v6e
topology: v6e:2x2x1
jax: 0.10.0
libtpu: 0.0.40
codegen_flags: <defaults>
</compile_context>

<pallas_src>
import jax
import jax.numpy as jnp
from jax import lax
from jax.experimental import pallas as pl
from jax.experimental.pallas import tpu as pltpu


def _round_up(a, b):
    return (a + b - 1) // b * b


def _cdiv(a, b):
    return (a + b - 1) // b


def ccam_dec_kernel(scale_ref, x_ref, y_ref, o_ref):
    # scale_ref: SMEM (1,) f32
    # x_ref:     VMEM (TC, HW) native dtype   (channel tile of one batch)
    # y_ref:     VMEM (K,  HW) native dtype   (resident across channel tiles)
    # o_ref:     VMEM (TC, HW)
    x = x_ref[...]
    y = y_ref[...]

    # energy = x @ y^T over spatial -> (TC, K); native-dtype MXU operands,
    # f32 accumulation (Mosaic does not demote f32 matmuls).
    energy = lax.dot_general(
        x, y,
        dimension_numbers=(((1,), (1,)), ((), ())),
        preferred_element_type=jnp.float32,
    )

    # softmax(rowmax(E) - E) == exp(rowmin(E) - E) / sum(...)
    # (mathematically exact rewrite: one row reduction instead of two).
    # Exact division -- the previous approx reciprocal cost ~1e-3 rel. error.
    p = jnp.exp(jnp.min(energy, axis=-1, keepdims=True) - energy)
    attention = p / jnp.sum(p, axis=-1, keepdims=True)

    # out = attention @ y -> (TC, HW); operands in y's dtype, f32 accumulate.
    out = jnp.dot(attention.astype(y_ref.dtype), y,
                  preferred_element_type=jnp.float32)

    scale = scale_ref[0]
    if o_ref.dtype == jnp.float32:
        o_ref[...] = x.astype(jnp.float32) + scale * out
    else:
        # bf16 residual epilogue: halves VPU / store work on v6e/v7x.
        o_ref[...] = x + (scale * out).astype(o_ref.dtype)


def _pick_channel_tile(C, K, HW, itemsize, budget_bytes):
    """Largest channel tile whose pipelined working set fits the VMEM budget."""
    c8 = _round_up(C, 8)
    hw_v = _round_up(HW, 128)            # VMEM buffers are lane-padded
    k_v = _round_up(K, 8)

    def need(tc):
        return (2 * tc * hw_v * itemsize          # x block, double-buffered
                + 2 * tc * hw_v * itemsize        # out block, double-buffered
                + 2 * k_v * hw_v * itemsize       # y slab (2 buffers allocated,
                                                  #  only DMA'd once per batch)
                + tc * hw_v * 4                   # f32 attention@y intermediate
                + 2 * tc * _round_up(K, 128) * 4)  # energy / p (f32, lane-padded)

    for cand in (512, 384, 256, 192, 128, 96, 64, 48, 32, 24, 16, 8):
        if cand > c8:
            continue
        if need(cand) <= budget_bytes:
            return cand
    return 8


def ccam_dec(x, y, scale):
    """x: (N, C, H, W), y: (N, K, H, W), scale: (1,) -> (N, C, H, W)"""
    N, C, H, W = x.shape
    Ny, K, Hy, Wy = y.shape
    assert (N, H, W) == (Ny, Hy, Wy)
    HW = H * W
    itemsize = jnp.dtype(x.dtype).itemsize

    # Chip-dependent VMEM budget: v5e/v6e have 128 MiB physical VMEM,
    # v7x only 64 MiB (smaller budget, still far above the default scoped 32M).
    try:
        vmem_cap = pltpu.get_tpu_info().vmem_capacity_bytes
    except Exception:
        vmem_cap = 64 * 1024 * 1024
    if vmem_cap > 64 * 1024 * 1024:          # v5e / v6e
        budget, vmem_limit = 64 * 1024 * 1024, 96 * 1024 * 1024
    else:                                    # v7x (or unknown: conservative)
        budget, vmem_limit = 38 * 1024 * 1024, 48 * 1024 * 1024

    TC = _pick_channel_tile(C, K, HW, itemsize, budget)
    if N == 1 and C >= 16:
        # Megacore balance (v7x has 2 TensorCores): if the batch axis cannot
        # be split, guarantee at least 2 channel tiles.
        TC = min(TC, _round_up(_cdiv(C, 2), 8))
    if TC >= C:
        TC = C                               # single full-extent channel tile
    n_ct = _cdiv(C, TC)                      # ragged last tile handled by Pallas

    # Reshapes are free (contiguous views); no jnp.pad / output slice passes.
    x_r = x.reshape(N, C, HW)
    y_r = y.reshape(N, K, HW)

    cost = pl.CostEstimate(
        flops=4 * N * C * K * HW,                 # two matmuls
        transcendentals=N * C * K,                # exp
        bytes_accessed=(2 * N * C * HW + N * K * HW) * itemsize,
    )

    out = pl.pallas_call(
        ccam_dec_kernel,
        out_shape=jax.ShapeDtypeStruct((N, C, HW), x.dtype),
        grid_spec=pl.GridSpec(
            grid=(N, n_ct),
            in_specs=[
                pl.BlockSpec(memory_space=pltpu.MemorySpace.SMEM),   # scale
                pl.BlockSpec((pl.Squeezed(), TC, HW),
                             lambda b, c: (b, c, 0)),                # x tile
                pl.BlockSpec((pl.Squeezed(), K, HW),
                             lambda b, c: (b, 0, 0)),                # y slab (resident)
            ],
            out_specs=pl.BlockSpec((pl.Squeezed(), TC, HW),
                                   lambda b, c: (b, c, 0)),
        ),
        compiler_params=pltpu.CompilerParams(
            dimension_semantics=("parallel", "parallel"),
            vmem_limit_bytes=vmem_limit,
        ),
        cost_estimate=cost,
    )(scale, x_r, y_r)

    return out.reshape(N, C, H, W)


def ccam_dec_ref(x, y, scale):
    """Pure-JAX reference mirroring the PyTorch forward (exact f32 math)."""
    N, C, H, W = x.shape
    K = y.shape[1]
    xq = x.reshape(N, C, -1).astype(jnp.float32)
    yk = y.reshape(N, K, -1).astype(jnp.float32)
    energy = jnp.einsum("ncs,nks->nck", xq, yk, precision="highest")
    energy_new = jnp.max(energy, axis=-1, keepdims=True) - energy
    attn = jax.nn.softmax(energy_new, axis=-1)
    out = jnp.einsum("nck,nks->ncs", attn, yk,
                     precision="highest").reshape(N, C, H, W)
    return (x.astype(jnp.float32) + scale * out).astype(x.dtype)


if __name__ == "__main__":
    key = jax.random.PRNGKey(0)
    kx, ky, kx2, ky2, kx3, ky3 = jax.random.split(key, 6)

    # nn.Parameter(torch.zeros(1)) -> shape (1,); use a nonzero value so the
    # attention path is actually exercised.
    scale = jnp.array([0.5], dtype=jnp.float32)

    # Case 1: aligned small shapes.
    N, C, K, H, W = 2, 4, 8, 16, 16
    x = jax.random.normal(kx, (N, C, H, W), dtype=jnp.float32)
    y = jax.random.normal(ky, (N, K, H, W), dtype=jnp.float32)
    out = jax.block_until_ready(ccam_dec(x, y, scale))
    ref = ccam_dec_ref(x, y, scale)
    assert out.shape == (N, C, H, W)
    assert jnp.allclose(out, ref, atol=5e-3, rtol=5e-3), \
        f"case1 max abs err {jnp.max(jnp.abs(out - ref))}"

    # Case 2: unaligned C and HW (no wrapper padding; full-extent last dim).
    N2, C2, K2, H2, W2 = 2, 20, 8, 12, 12
    x2 = jax.random.normal(kx2, (N2, C2, H2, W2), dtype=jnp.float32)
    y2 = jax.random.normal(ky2, (N2, K2, H2, W2), dtype=jnp.float32)
    out2 = jax.block_until_ready(ccam_dec(x2, y2, scale))
    ref2 = ccam_dec_ref(x2, y2, scale)
    assert out2.shape == (N2, C2, H2, W2)
    assert jnp.allclose(out2, ref2, atol=5e-3, rtol=5e-3), \
        f"case2 max abs err {jnp.max(jnp.abs(out2 - ref2))}"

    # Case 3: N == 1 with C not a multiple of the tile -> exercises the
    # megacore-balance cap and the ragged (masked-store) last channel tile.
    N3, C3, K3, H3, W3 = 1, 20, 8, 12, 12
    x3 = jax.random.normal(kx3, (N3, C3, H3, W3), dtype=jnp.float32)
    y3 = jax.random.normal(ky3, (N3, K3, H3, W3), dtype=jnp.float32)
    out3 = jax.block_until_ready(ccam_dec(x3, y3, scale))
    ref3 = ccam_dec_ref(x3, y3, scale)
    assert out3.shape == (N3, C3, H3, W3)
    assert jnp.allclose(out3, ref3, atol=5e-3, rtol=5e-3), \
        f"case3 max abs err {jnp.max(jnp.abs(out3 - ref3))}"

    print("KERNEL_OK")
</pallas_src>

<mosaic_0001>
module attributes {stable_mosaic.version = 11 : i64} {
  func.func @ccam_dec_kernel(%arg0: i32, %arg1: i32, %arg2: memref<1xf32, #tpu.memory_space<smem>>, %arg3: memref<1x4x256xf32, #tpu.memory_space<vmem>>, %arg4: memref<1x8x256xf32, #tpu.memory_space<vmem>>, %arg5: memref<1x4x256xf32, #tpu.memory_space<vmem>>) attributes {dimension_semantics = [#tpu.dimension_semantics<parallel>, #tpu.dimension_semantics<parallel>], iteration_bounds = array<i64: 2, 1>, scalar_prefetch = 0 : i64, scratch_operands = 0 : i64, tpu.core_type = #tpu.core_type<tc>, window_params = [{transform_indices = @transform_0, window_bounds = array<i64: 1>}, {transform_indices = @transform_1, window_bounds = array<i64: 1, 4, 256>}, {transform_indices = @transform_2, window_bounds = array<i64: 1, 8, 256>}, {transform_indices = @transform_3, window_bounds = array<i64: 1, 4, 256>}]} {
    %c0 = arith.constant 0 : index
    %c0_0 = arith.constant 0 : index
    %c0_1 = arith.constant 0 : index
    %0 = vector.load %arg3[%c0, %c0_0, %c0_1] : memref<1x4x256xf32, #tpu.memory_space<vmem>>, vector<1x4x256xf32>
    %1 = vector.shape_cast %0 : vector<1x4x256xf32> to vector<4x256xf32>
    %c0_2 = arith.constant 0 : index
    %c0_3 = arith.constant 0 : index
    %c0_4 = arith.constant 0 : index
    %2 = vector.load %arg4[%c0_2, %c0_3, %c0_4] : memref<1x8x256xf32, #tpu.memory_space<vmem>>, vector<1x8x256xf32>
    %3 = vector.shape_cast %2 : vector<1x8x256xf32> to vector<8x256xf32>
    %cst = arith.constant dense<0.000000e+00> : vector<4x8xf32>
    %4 = tpu.matmul %1, %3, %cst {dimension_numbers = #tpu.dot_dimension_numbers<[1], [1], [0], [0], [0, 0, 1, 0], [], []>} : vector<4x256xf32>, vector<8x256xf32>, vector<4x8xf32> -> vector<4x8xf32>
    %cst_5 = arith.constant dense<0x7F800000> : vector<4xf32>
    %5 = vector.multi_reduction <minimumf>, %4, %cst_5 [1] : vector<4x8xf32> to vector<4xf32>
    %6 = vector.shape_cast %5 : vector<4xf32> to vector<4x1xf32>
    %7 = vector.broadcast %6 : vector<4x1xf32> to vector<4x8xf32>
    %8 = arith.subf %7, %4 : vector<4x8xf32>
    %9 = math.exp %8 : vector<4x8xf32>
    %cst_6 = arith.constant dense<0.000000e+00> : vector<4xf32>
    %10 = vector.multi_reduction <add>, %9, %cst_6 [1] : vector<4x8xf32> to vector<4xf32>
    %11 = vector.shape_cast %10 : vector<4xf32> to vector<4x1xf32>
    %12 = vector.broadcast %11 : vector<4x1xf32> to vector<4x8xf32>
    %13 = arith.divf %9, %12 : vector<4x8xf32>
    %cst_7 = arith.constant dense<0.000000e+00> : vector<4x256xf32>
    %14 = tpu.matmul %13, %3, %cst_7 {dimension_numbers = #tpu.dot_dimension_numbers<[1], [0], [0], [1], [0, 0, 1, 1], [], []>} : vector<4x8xf32>, vector<8x256xf32>, vector<4x256xf32> -> vector<4x256xf32>
    %c0_8 = arith.constant 0 : index
    %15 = memref.load %arg2[%c0_8] : memref<1xf32, #tpu.memory_space<smem>>
    %16 = vector.broadcast %15 : f32 to vector<4x256xf32>
    %17 = arith.mulf %16, %14 : vector<4x256xf32>
    %18 = arith.addf %1, %17 : vector<4x256xf32>
    %c0_9 = arith.constant 0 : index
    %c0_10 = arith.constant 0 : index
    %c0_11 = arith.constant 0 : index
    %19 = vector.load %arg5[%c0_9, %c0_10, %c0_11] : memref<1x4x256xf32, #tpu.memory_space<vmem>>, vector<1x4x256xf32>
    %20 = vector.shape_cast %19 : vector<1x4x256xf32> to vector<4x256xf32>
    %21 = vector.shape_cast %18 : vector<4x256xf32> to vector<1x4x256xf32>
    tpu.vector_store %arg5[%c0_9, %c0_10, %c0_11], %21 {strides = array<i32>} : memref<1x4x256xf32, #tpu.memory_space<vmem>>, vector<1x4x256xf32>,
    return
  }
  func.func @transform_0(%arg0: i32, %arg1: i32) -> i32 {
    %c0_i32 = arith.constant 0 : i32
    %c0_i32_0 = arith.constant 0 : i32
    return %c0_i32 : i32
  }
  func.func @transform_1(%arg0: i32, %arg1: i32) -> (i32, i32, i32) {
    %c0_i32 = arith.constant 0 : i32
    %c0_i32_0 = arith.constant 0 : i32
    return %arg0, %arg1, %c0_i32 : i32, i32, i32
  }
  func.func @transform_2(%arg0: i32, %arg1: i32) -> (i32, i32, i32) {
    %c0_i32 = arith.constant 0 : i32
    %c0_i32_0 = arith.constant 0 : i32
    %c0_i32_1 = arith.constant 0 : i32
    return %arg0, %c0_i32, %c0_i32_0 : i32, i32, i32
  }
  func.func @transform_3(%arg0: i32, %arg1: i32) -> (i32, i32, i32) {
    %c0_i32 = arith.constant 0 : i32
    %c0_i32_0 = arith.constant 0 : i32
    return %arg0, %arg1, %c0_i32 : i32, i32, i32
  }
}

</mosaic_0001>

<bundles_post_ra>
// kernel: tpu_custom_call.1
= control target key start
LH: loop header
LB: loop body
LE: loop exit
PB: predicated region body
PF: predicated region fallthrough
CT: control target
= control target key end

     0   :  { %s974_s0 = inlined_call_operand.<no memory space> [shape: f32[1], index: 0, kind: input, shape index: {}]   ;;  %s975_s1 = inlined_call_operand.hbm [shape: f32[2,4,256], index: 1, kind: input, shape index: {}]   ;;  %s976_s2 = inlined_call_operand.hbm [shape: f32[2,8,256], index: 2, kind: input, shape index: {}]   ;;  %s977_s3 = inlined_call_operand.hbm [shape: f32[2,4,256], index: 3, kind: output, shape index: {}]  }
   0x1   :  { %8 = sst [smem:[#allocation2]] %s974_s0 }
   0x2   :  { %9 = vsyncpa [#allocation4], 0 }
   0x3   :  { %11 = vsyncpa [#allocation4 + $0x1], 0 }
   0x4   :  { %12 = vsyncpa [#allocation7], 0 }
   0x5   :  { %14 = vsyncpa [#allocation7 + $0x1], 0 }
   0x6   :  { %15 = vsyncpa [#allocation5], 0 }
   0x7   :  { %17 = vsyncpa [#allocation5 + $0x1], 0  ;;  %s806_s14 = smov 0   ;;  %s808_s15 = smov 0  }
   0x8   :  { %s810_s16 = smov 0   ;;  %s812_s17 = smov 0  }
   0x9   :  { %s814_s18 = smov 0   ;;  %s816_s19 = smov 0  }
   0xa LB: > { %s541_s0 = sadd.s32 4294967295, %s777_s19   ;;  %s542_s20 = sadd.s32 4294967294, %s777_s19   ;;  %s777_s19 = sphi %s816_s19, %s23_s19   ;;  %s773_s18 = sphi %s814_s18, %s989_s18   ;;  %s769_s17 = sphi %s812_s17, %s988_s17   ;;  %s765_s16 = sphi %s810_s16, %s987_s16   ;;  %s761_s15 = sphi %s808_s15, %s986_s15   ;;  %s757_s14 = sphi %s806_s14, %s985_s14  }
   0xb   : > { %s35_s21 = sadd.s32 1, %s773_s18  ;;  %s65_s22 = sadd.s32 1, %s765_s16 }
   0xc   : > { %p37_p0 = scmp.ge.s32.totalorder %s35_s21, 2  ;;  %p72_p1 = scmp.ne.s32.totalorder %s765_s16, %s761_s15 }
   0xd   : > { %p73_p2 = scmp.eq.s32.totalorder %s777_s19, 0  ;;  %p78_p3 = scmp.ne.s32.totalorder %s761_s15, %s757_s14 }
   0xe   : > { %s991_s21 = smov (%p37_p0, %s35_s21), 0  ;;  %p79_p5 = scmp.eq.s32.totalorder %s541_s0, 0 }
   0xf   : > { %p847_p4 = por %p73_p2, %p72_p1  ;;  %s60_s24 = ssub.s32 %s773_s18, %s991_s21 }
  0x10   : > { %p130_p6 = scmp.eq.s32.totalorder %s541_s0, 1  ;;  %p63_p7 = scmp.eq.s32.totalorder %s60_s24, 0 }
  0x11   : > { %p853_p8 = por %p79_p5, %p78_p3  ;;  %p136_p10 = scmp.eq.s32.totalorder %s542_s20, 1 }
  0x12   : > { %p857_p9 = por %p130_p6, %p72_p1  ;;  %p581_p13 = scmp.lt.s32.totalorder %s777_s19, 2 }
  0x13   : > { %s862_s27 = scalar_select %p63_p7, %s765_s16, %s65_s22  }
  0x14   : > { %p864_p11 = por %p136_p10, %p78_p3  ;;  %s871_s29 = sand.u32 1, %s765_s16  }
  0x15   : > { %s545_s30 = sshll.u32 %s871_s29, 3  ;;  %s561_s4 = sshll.u32 %s773_s18, 7 }
  0x16   : > { %s171_s7 = scalar_lea.hbm %s975_s1, %s561_s4  ;;  %s163_s8 = scalar_lea.vmem [#allocation3], %s545_s30 }
  0x17   : > { %s173_s9 = sshll.u32 %s163_s8, 4  ;;  %p880_p0 = pnand %p581_p13, %p847_p4  ;;  %s174_s9 = int_to_ptr.vmem [resolvable:$true] %s173_s9 }
  0x18   : > { %p551_p1 = scmp.ge.s32.totalorder %s777_s19, 1  ;;  %p197_p2 = scmp.lt.s32.totalorder %s777_s19, 3 }
  0x19   : > { %s160_s11 = scalar_lea.sflag [#allocation4], %s871_s29  ;;  %p639_p3 = pneg %p880_p0 }
  0x1a   : > { %s650_s12 = scalar_lea.vmem %s174_s9, 128  ;;  %s779_s13 = smov [#allocation3]  }
  0x1b   : > { %p651_p5 = scmp.ne.s32.totalorder %s174_s9, %s650_s12  ;;  %s655_s0 = sshll.u32 %s779_s13, 4  ;;  %s656_s0 = int_to_ptr.vmem [resolvable:$false] %s655_s0 }
  0x1c   : > { %s657_s20 = scalar_lea.vmem %s656_s0, 256  ;;  %p658_p4 = scmp.lt.s32.totalorder %s174_s9, %s656_s0 }
  0x1d   : > { %p653_p6 = pnand %p651_p5, %p639_p3  ;;  %p659_p10 = scmp.lt.s32.totalorder %s657_s20, %s650_s12 }
  0x1f   : > { %p654_p7 = pneg %p653_p6  ;;  %p660_p13 = por %p659_p10, %p658_p4 }
  0x21   : > { %p661_p12 = pnand %p660_p13, %p654_p7 }
  0x23   : > { %664 = shalt.err (!%p661_p12)
}
  0x24   : > { %573 = dma.hbm_to_vmem [thread:$0]  (!%p880_p0), %s171_s7, 128, %s174_s9, %s160_s11  }
  0x25   : > { %p898_p5 = pnand %p551_p1, %p197_p2  ;;  %s548_s23 = sshll.u32 %s871_s29, 4 }
  0x26   : > { %s562_s24 = sshll.u32 %s773_s18, 8  ;;  %s184_s6 = scalar_lea.vmem [#allocation6], %s548_s23 }
  0x27   : > { %s190_s5 = scalar_lea.hbm %s976_s2, %s562_s24  ;;  %s192_s8 = sshll.u32 %s184_s6, 4  ;;  %s193_s8 = int_to_ptr.vmem [resolvable:$true] %s192_s8 }
  0x28   : > { %s181_s12 = scalar_lea.sflag [#allocation7], %s871_s29  ;;  %s678_s13 = scalar_lea.vmem %s193_s8, 256 }
  0x29   : > { %p679_p12 = scmp.ne.s32.totalorder %s193_s8, %s678_s13  ;;  %s780_s7 = smov [#allocation6]  }
  0x2a   : > { %s683_s9 = sshll.u32 %s780_s7, 4  ;;  %s684_s9 = int_to_ptr.vmem [resolvable:$false] %s683_s9 }
  0x2b   : > { %p681_p6 = pnand %p679_p12, %p639_p3  ;;  %s685_s11 = scalar_lea.vmem %s684_s9, 512 }
  0x2c   : > { %p686_p1 = scmp.lt.s32.totalorder %s193_s8, %s684_s9  ;;  %p687_p2 = scmp.lt.s32.totalorder %s685_s11, %s678_s13 }
  0x2d   : > { %p682_p7 = pneg %p681_p6 }
  0x2e   : > { %p688_p4 = por %p687_p2, %p686_p1 }
  0x30   : > { %p689_p10 = pnand %p688_p4, %p682_p7 }
  0x32   : > { %692 = shalt.err (!%p689_p10)
}
  0x33   : > { %576 = dma.hbm_to_vmem [thread:$0]  (!%p880_p0), %s190_s5, 256, %s193_s8, %s181_s12  }
  0x34   : > { %201 = sbr.rel (%p898_p5) target bundleno = 785 (0x311), region = 32  ;;  %s916_s29 = sand.u32 (!%p898_p5), 1, %s761_s15  }
  0x35   : > { %s552_s0 = sshll.u32 (!%p898_p5), %s916_s29, 3  ;;  %s204_s20 = scalar_lea.sflag (!%p898_p5), [#allocation4], %s916_s29 }
  0x36   : > { %s207_s23 = scalar_lea.vmem (!%p898_p5), [#allocation3], %s552_s0 }
  0x39   : > { %744 = dma.done.wait (%p853_p8), %s204_s20, 128  }
  0x3a   : > { %746 = vsyncadd (%p853_p8), %s204_s20, 4294967168  ;;  %s553_s10 = sshll.u32 %s916_s29, 4  ;;  %s213_s22 = scalar_lea.sflag [#allocation7], %s916_s29 }
  0x3b   : > { %s216_s24 = scalar_lea.vmem [#allocation6], %s553_s10 }
  0x3c   : > { %748 = dma.done.wait (%p853_p8), %s213_s22, 256  }
  0x3d   : > { %750 = vsyncadd (%p853_p8), %s213_s22, 4294967040  ;;  %v246_v0 = vld [vmem:[%s216_s24 + $0x8] sm:$0xff]  ;;  %v245_v1 = vld [vmem:[%s216_s24] sm:$0xff]  ;;  %vm320_vm0 = vcmask 60416   ;;  %v781_v12 = vmov 0.0   ;;  %vm332_vm1 = vcmask 64512  }
  0x3e   : > { %v244_v2 = vld [vmem:[%s207_s23] sm:$0xff]  ;;  %280 = vmatprep.subr.mxu0 %v246_v0  ;;  %366 = vmatprep.subr.mxu1 %v246_v0  ;;  %s407_s25 = sld [smem:[#allocation2]]  ;;  %s563_s30 = sshll.u32 %s769_s17, 7 }
  0x3f   : > { %v248_v3 = vcombine.high %v244_v2, %v244_v2  ;;  %281 = vmatpush1.xpose.msra.mxu0 %v245_v1  ;;  %367 = vmatpush1.msra.mxu1 %v245_v1  ;;  %s243_s4 = scalar_lea.vmem [#allocation8], %s552_s0  ;;  %s432_s12 = scalar_lea.hbm %s977_s3, %s563_s30 }
  0x40   : > { %400 = vmatprep.mubr.f32.mxu1 %v781_v12  ;;  %s434_s5 = sshll.u32 %s243_s4, 4  ;;  %s418_s13 = scalar_lea.sflag [#allocation5], %s916_s29  ;;  %s435_s5 = int_to_ptr.vmem [resolvable:$true] %s434_s5 }
  0x41   : > { %314 = vmatprep.mubr.f32.mxu0 %v248_v3  ;;  %s693_s7 = scalar_lea.vmem %s435_s5, 128  ;;  %s782_s9 = smov [#allocation8]  }
  0x42   : > { %315 = vmatmul.mubr.f32.vlgmr.msra.gmra.mxu0 %v244_v2  ;;  %p694_p8 = scmp.ne.s32.totalorder %s435_s5, %s693_s7  ;;  %s697_s11 = sshll.u32 %s782_s9, 4  ;;  %s698_s11 = int_to_ptr.vmem [resolvable:$false] %s697_s11 }
  0x43   : > { %s699_s17 = scalar_lea.vmem %s698_s11, 256  ;;  %p700_p13 = scmp.lt.s32.totalorder %s435_s5, %s698_s11 }
  0x44   : > { %v408_v17 = vstv %s407_s25  ;;  %p695_p0 = pnand %p694_p8, %p857_p9  ;;  %p701_p5 = scmp.lt.s32.totalorder %s699_s17, %s693_s7 }
  0x46   : > { %p696_p3 = pneg %p695_p0  ;;  %p702_p12 = por %p701_p5, %p700_p13 }
  0x48   : > { %p703_p6 = pnand %p702_p12, %p696_p3 }
 0x102   : > { %v316_v4 = vpop.f32.mrf.mxu0 }
 0x103   : > { %v321_v5 = vsel %vm320_vm0, %v316_v4, inf }
 0x104   : > { %322 = vmin.xlane.f32.xlu0 %v321_v5  ;;  %v318_v6 = vpop.f32.mrf.mxu0 }
 0x18d   : > { %v323_v7 = vpop.xlane.xlu0 %322 }
 0x18e   : > { %v324_v8 = vsub.f32 %v323_v7, %v316_v4 }
 0x190   : > { %v325_v9 = vmul.f32 1.442695, %v324_v8 }
 0x192   : > { %633 = vpow2.f32 %v325_v9 }
 0x19f   : > { %v634_v10 = vpop.eup %633 }
 0x1a0   : > { %v327_v11 = vsel %vm320_vm0, %v634_v10, 0.0 }
 0x1a1   : > { %328 = vadd.xlane.f32.xlu0 %v327_v11 }
 0x22a   : > { %v329_v13 = vpop.xlane.xlu0 %328 }
 0x22b   : > { %635 = vrcp.f32 %v329_v13 }
 0x238   : > { %v636_v14 = vpop.eup %635 }
 0x239   : > { %v331_v15 = vmul.f32 %v636_v14, %v634_v10 }
 0x23b   : > { %555 = vmatmul.mubr.msk.f32.vlgmr.msra.gmra.mxu1 %vm332_vm1, %v331_v15 }
 0x2fb   : > { %v402_v16 = vpop.f32.mrf.mxu1 }
 0x2fc   : > { %v409_v19 = vmul.f32 %v408_v17, %v402_v16 }
 0x2fd   : > { %v404_v18 = vpop.f32.mrf.mxu1 }
 0x2fe   : > { %v410_v20 = vmul.f32 %v408_v17, %v404_v18 }
 0x300   : > { %v413_v21 = vcombine.low %v409_v19, %v410_v20 }
 0x302   : > { %v415_v22 = vadd.f32 %v413_v21, %v244_v2 }
 0x304   : > { %416 = vst [vmem:[%s243_s4] sm:$0xff] %v415_v22 }
 0x305   : > { %706 = shalt.err (!%p703_p6)
}
 0x306   : > { %s707_s0 = scalar_lea.hbm %s432_s12, 128  ;;  %s711_s23 = scalar_lea.hbm %s977_s3, 256 }
 0x307   : > { %p708_p7 = scmp.ne.s32.totalorder %s432_s12, %s707_s0  ;;  %p712_p4 = scmp.lt.s32.totalorder %s432_s12, %s977_s3 }
 0x308   : > { %p713_p10 = scmp.lt.s32.totalorder %s711_s23, %s707_s0 }
 0x309   : > { %p709_p1 = pnand %p708_p7, %p857_p9 }
 0x30a   : > { %p714_p8 = por %p713_p10, %p712_p4 }
 0x30b   : > { %p710_p2 = pneg %p709_p1 }
 0x30d   : > { %p715_p0 = pnand %p714_p8, %p710_p2 }
 0x30f   : > { %718 = shalt.err (!%p715_p0)
}
 0x310   : > { %568 = dma.vmem_to_hbm [thread:$0]  (%p857_p9), %s435_s5, 128, %s432_s12, %s418_s13  }
 0x311 PF: > { %s446_s24 = sand.u32 1, %s757_s14   ;;  %p984_p3 = scmp.ge.s32.totalorder %s777_s19, 2 }
 0x312   : > { %s447_s25 = scalar_lea.sflag [#allocation5], %s446_s24 }
 0x313   : > { %p578_p13 = pnand %p984_p3, %p864_p11 }
 0x315   : > { %p579_p5 = pneg %p578_p13 }
 0x317   : > { %752 = dma.done.wait (%p579_p5), %s447_s25, 128  }
 0x318   : > { %754 = vsyncadd (%p579_p5), %s447_s25, 4294967168  ;;  %s23_s19 = sadd.s32 1, %s777_s19   ;;  %s985_s14 = smov %s761_s15 }
 0x319   : > { %p20_p12 = scmp.ge.s32.totalorder %s23_s19, 4   ;;  %s986_s15 = smov %s765_s16 }
 0x31a   : > { %s987_s16 = smov %s862_s27  ;;  %s988_s17 = smov %s773_s18 }
 0x31b   : > { %s989_s18 = smov %s991_s21  ;;  %22 = sbr.rel (!%p20_p12) target bundleno = 10 (0xa), region = 90 }
 0x320   :  { %452 = vsyncpa [#allocation4], 1 }
 0x321   :  { %454 = vsyncpa [#allocation4 + $0x1], 1 }
 0x322   :  { %455 = vsyncpa [#allocation7], 1 }
 0x323   :  { %457 = vsyncpa [#allocation7 + $0x1], 1 }
 0x324   :  { %458 = vsyncpa [#allocation5], 1 }
 0x325   :  { %460 = vsyncpa [#allocation5 + $0x1], 1 }

</bundles_post_ra>
